<compile_context>
chip_gen: v6e
topology: v6e:2x2x1
jax: 0.10.0
libtpu: 0.0.40
codegen_flags: <defaults>
</compile_context>

<pallas_src>
import functools

import jax
import jax.numpy as jnp
from jax.experimental import pallas as pl
from jax.experimental.pallas import tpu as pltpu

_IGNORE_INDEX = -100  # PyTorch NLLLoss default


def _ce2d_kernel(logits_ref, tgt_ref, out_ref, *, hw, tile_p_divides_hw,
                 ignore_index):
    """One (image, pixel-tile) grid step.

    logits_ref: (1, C, TP)  native-dtype logits; class on sublanes, pixels on lanes
    tgt_ref:    (1, 1, TP)  int32 target class per pixel
    out_ref:    (1, 2, TP)  f32 accumulator; row 0 = sum of NLL, row 1 = valid count
    """
    j = pl.program_id(1)
    c, tp = logits_ref.shape[1], logits_ref.shape[2]

    @pl.when(j == 0)
    def _():
        out_ref[...] = jnp.zeros_like(out_ref)

    # Stable log-sum-exp over the class (sublane) axis, per pixel lane.
    x = logits_ref[0].astype(jnp.float32)                        # (C, TP)
    m = jnp.max(x, axis=0, keepdims=True)                        # (1, TP)
    z = x - m
    lse = jnp.log(jnp.sum(jnp.exp(z), axis=0, keepdims=True))    # (1, TP)

    # z[target] per pixel via one-hot compare along the class axis.
    # (For ignore_index targets nothing matches -> 0; masked out below.)
    tgt = tgt_ref[0]                                             # (1, TP) int32
    cls = jax.lax.broadcasted_iota(jnp.int32, (c, tp), 0)
    zt = jnp.sum(jnp.where(cls == tgt, z, 0.0),
                 axis=0, keepdims=True)                          # (1, TP)

    # NLL = -(z[target] - lse) = lse - z[target]
    contrib = tgt != ignore_index                                # (1, TP) bool
    if not tile_p_divides_hw:
        pix = j * tp + jax.lax.broadcasted_iota(jnp.int32, (1, tp), 1)
        contrib = contrib & (pix < hw)

    nll = jnp.where(contrib, lse - zt, 0.0)                      # (1, TP)
    cnt = contrib.astype(jnp.float32)                            # (1, TP)
    out_ref[...] += jnp.concatenate([nll, cnt], axis=0)[None]    # (1, 2, TP)


def _pick_tile_p(hw, c, itemsize):
    # ~4 MiB logits block: double-buffered inputs + targets + resident output
    # stay comfortably under the 32 MiB scoped-VMEM limit requested below.
    budget = 4 * 1024 * 1024
    cap = max(128, (budget // max(1, c * itemsize)) // 128 * 128)
    if hw <= 128:
        return hw                        # single block == full pixel dim
    return min(cap, (hw // 128) * 128)   # multiple of 128; ragged tail is masked


def cross_entropy_loss_2d(logits, targets, *, ignore_index=_IGNORE_INDEX):
    """JAX/Pallas equivalent of CrossEntropyLoss2d (weight=None, reduction='mean').

    logits:  (N, C, H, W) float (any float dtype; cast to f32 inside the kernel)
    targets: (N, H, W) int class indices (ignore_index entries are skipped)
    returns: scalar f32 mean loss
    """
    # TODO(synk): per-class `weight` and reduction='sum'/'none' not implemented
    # (module defaults weight=None, reduction='mean' are what is implemented).
    n, c, h, w = logits.shape
    hw = h * w

    x = logits.reshape(n, c, hw)          # free reshape, native dtype, no transpose
    t = targets.reshape(n, 1, hw)
    if t.dtype != jnp.int32:
        t = t.astype(jnp.int32)

    tile_p = _pick_tile_p(hw, c, jnp.dtype(logits.dtype).itemsize)
    grid = (n, pl.cdiv(hw, tile_p))

    kernel = functools.partial(
        _ce2d_kernel,
        hw=hw,
        tile_p_divides_hw=(hw % tile_p == 0),
        ignore_index=ignore_index,
    )

    partial = pl.pallas_call(
        kernel,
        out_shape=jax.ShapeDtypeStruct((n, 2, tile_p), jnp.float32),
        grid_spec=pltpu.PrefetchScalarGridSpec(
            num_scalar_prefetch=0,
            grid=grid,
            in_specs=[
                pl.BlockSpec((1, c, tile_p), lambda i, j: (i, 0, j)),
                pl.BlockSpec((1, 1, tile_p), lambda i, j: (i, 0, j)),
            ],
            out_specs=pl.BlockSpec((1, 2, tile_p), lambda i, j: (i, 0, 0)),
        ),
        compiler_params=pltpu.CompilerParams(
            dimension_semantics=("parallel", "arbitrary"),
            vmem_limit_bytes=32 * 1024 * 1024,
        ),
    )(x, t)

    total = jnp.sum(partial[:, 0, :])
    count = jnp.sum(partial[:, 1, :])
    return total / count


if __name__ == "__main__":
    key = jax.random.PRNGKey(0)
    k1, k2 = jax.random.split(key)

    N, C, H, W = 2, 4, 16, 16
    logits = jax.random.normal(k1, (N, C, H, W), dtype=jnp.float32)
    targets = jax.random.randint(k2, (N, H, W), 0, C, dtype=jnp.int32)

    loss = cross_entropy_loss_2d(logits, targets)
    loss = jax.block_until_ready(loss)

    # pure-JAX reference: NLLLoss(log_softmax(x, dim=1), t), mean reduction
    logp = jax.nn.log_softmax(logits, axis=1)
    ref = -jnp.mean(jnp.take_along_axis(logp, targets[:, None, :, :], axis=1))
    assert jnp.allclose(loss, ref, atol=1e-5, rtol=1e-5), (loss, ref)

    print("KERNEL_OK")
</pallas_src>

<mosaic_0001>
module attributes {stable_mosaic.version = 11 : i64} {
  func.func @_ce2d_kernel(%arg0: i32, %arg1: i32, %arg2: memref<1x4x256xf32, #tpu.memory_space<vmem>>, %arg3: memref<1x1x256xi32, #tpu.memory_space<vmem>>, %arg4: memref<1x2x256xf32, #tpu.memory_space<vmem>>) attributes {dimension_semantics = [#tpu.dimension_semantics<parallel>, #tpu.dimension_semantics<arbitrary>], iteration_bounds = array<i64: 2, 1>, scalar_prefetch = 0 : i64, scratch_operands = 0 : i64, tpu.core_type = #tpu.core_type<tc>, window_params = [{transform_indices = @transform_0, window_bounds = array<i64: 1, 4, 256>}, {transform_indices = @transform_1, window_bounds = array<i64: 1, 1, 256>}, {transform_indices = @transform_2, window_bounds = array<i64: 1, 2, 256>}]} {
    %c0_i32 = arith.constant 0 : i32
    %0 = arith.cmpi eq, %arg1, %c0_i32 : i32
    %1 = arith.extui %0 : i1 to i32
    %c0_i32_0 = arith.constant 0 : i32
    %2 = arith.cmpi ne, %1, %c0_i32_0 : i32
    scf.if %2 {
      %cst_16 = arith.constant 0.000000e+00 : f32
      %34 = vector.broadcast %cst_16 : f32 to vector<1x2x256xf32>
      %c0_17 = arith.constant 0 : index
      %c0_18 = arith.constant 0 : index
      %c0_19 = arith.constant 0 : index
      %35 = vector.load %arg4[%c0_17, %c0_18, %c0_19] : memref<1x2x256xf32, #tpu.memory_space<vmem>>, vector<1x2x256xf32>
      tpu.vector_store %arg4[%c0_17, %c0_18, %c0_19], %34 {strides = array<i32>} : memref<1x2x256xf32, #tpu.memory_space<vmem>>, vector<1x2x256xf32>,
    } else {
    }
    %c0 = arith.constant 0 : index
    %c0_1 = arith.constant 0 : index
    %c0_2 = arith.constant 0 : index
    %3 = vector.load %arg2[%c0, %c0_1, %c0_2] : memref<1x4x256xf32, #tpu.memory_space<vmem>>, vector<1x4x256xf32>
    %4 = vector.shape_cast %3 : vector<1x4x256xf32> to vector<4x256xf32>
    %cst = arith.constant dense<0xFF800000> : vector<256xf32>
    %5 = vector.multi_reduction <maximumf>, %4, %cst [0] : vector<4x256xf32> to vector<256xf32>
    %6 = vector.shape_cast %5 : vector<256xf32> to vector<1x256xf32>
    %7 = vector.broadcast %6 : vector<1x256xf32> to vector<4x256xf32>
    %8 = arith.subf %4, %7 : vector<4x256xf32>
    %9 = math.exp %8 : vector<4x256xf32>
    %cst_3 = arith.constant dense<0.000000e+00> : vector<256xf32>
    %10 = vector.multi_reduction <add>, %9, %cst_3 [0] : vector<4x256xf32> to vector<256xf32>
    %11 = vector.shape_cast %10 : vector<256xf32> to vector<1x256xf32>
    %12 = math.log %11 : vector<1x256xf32>
    %c0_4 = arith.constant 0 : index
    %c0_5 = arith.constant 0 : index
    %c0_6 = arith.constant 0 : index
    %13 = vector.load %arg3[%c0_4, %c0_5, %c0_6] : memref<1x1x256xi32, #tpu.memory_space<vmem>>, vector<1x1x256xi32>
    %14 = vector.shape_cast %13 : vector<1x1x256xi32> to vector<1x256xi32>
    %15 = tpu.iota {dimensions = array<i32: 0>} : vector<4x256xi32>
    %16 = vector.broadcast %14 : vector<1x256xi32> to vector<4x256xi32>
    %17 = arith.cmpi eq, %15, %16 : vector<4x256xi32>
    %cst_7 = arith.constant 0.000000e+00 : f32
    %18 = vector.broadcast %cst_7 : f32 to vector<4x256xf32>
    %19 = arith.select %17, %8, %18 : vector<4x256xi1>, vector<4x256xf32>
    %cst_8 = arith.constant dense<0.000000e+00> : vector<256xf32>
    %20 = vector.multi_reduction <add>, %19, %cst_8 [0] : vector<4x256xf32> to vector<256xf32>
    %21 = vector.shape_cast %20 : vector<256xf32> to vector<1x256xf32>
    %c-100_i32 = arith.constant -100 : i32
    %22 = vector.broadcast %c-100_i32 : i32 to vector<1x256xi32>
    %23 = arith.cmpi ne, %14, %22 : vector<1x256xi32>
    %24 = arith.subf %12, %21 : vector<1x256xf32>
    %cst_9 = arith.constant 0.000000e+00 : f32
    %25 = vector.broadcast %cst_9 : f32 to vector<1x256xf32>
    %26 = arith.select %23, %24, %25 : vector<1x256xi1>, vector<1x256xf32>
    %27 = arith.extui %23 : vector<1x256xi1> to vector<1x256xi32>
    %28 = arith.sitofp %27 : vector<1x256xi32> to vector<1x256xf32>
    %c0_10 = arith.constant 0 : index
    %c0_11 = arith.constant 0 : index
    %c0_12 = arith.constant 0 : index
    %29 = vector.load %arg4[%c0_10, %c0_11, %c0_12] : memref<1x2x256xf32, #tpu.memory_space<vmem>>, vector<1x2x256xf32>
    %30 = tpu.concatenate %26, %28 in 0 : vector<1x256xf32>, vector<1x256xf32> -> vector<2x256xf32>
    %31 = vector.shape_cast %30 : vector<2x256xf32> to vector<1x2x256xf32>
    %32 = arith.addf %29, %31 : vector<1x2x256xf32>
    %c0_13 = arith.constant 0 : index
    %c0_14 = arith.constant 0 : index
    %c0_15 = arith.constant 0 : index
    %33 = vector.load %arg4[%c0_13, %c0_14, %c0_15] : memref<1x2x256xf32, #tpu.memory_space<vmem>>, vector<1x2x256xf32>
    tpu.vector_store %arg4[%c0_13, %c0_14, %c0_15], %32 {strides = array<i32>} : memref<1x2x256xf32, #tpu.memory_space<vmem>>, vector<1x2x256xf32>,
    return
  }
  func.func @transform_0(%arg0: i32, %arg1: i32) -> (i32, i32, i32) {
    %c0_i32 = arith.constant 0 : i32
    %c0_i32_0 = arith.constant 0 : i32
    return %arg0, %c0_i32, %arg1 : i32, i32, i32
  }
  func.func @transform_1(%arg0: i32, %arg1: i32) -> (i32, i32, i32) {
    %c0_i32 = arith.constant 0 : i32
    %c0_i32_0 = arith.constant 0 : i32
    return %arg0, %c0_i32, %arg1 : i32, i32, i32
  }
  func.func @transform_2(%arg0: i32, %arg1: i32) -> (i32, i32, i32) {
    %c0_i32 = arith.constant 0 : i32
    %c0_i32_0 = arith.constant 0 : i32
    %c0_i32_1 = arith.constant 0 : i32
    return %arg0, %c0_i32, %c0_i32_0 : i32, i32, i32
  }
}

</mosaic_0001>

<bundles_post_ra>
// kernel: tpu_custom_call.1
= control target key start
LH: loop header
LB: loop body
LE: loop exit
PB: predicated region body
PF: predicated region fallthrough
CT: control target
= control target key end

     0   :  { %7 = vsyncpa [#allocation3], 0  ;;  %s952_s0 = inlined_call_operand.hbm [shape: f32[2,4,256], index: 0, kind: input, shape index: {}]   ;;  %s953_s1 = inlined_call_operand.hbm [shape: s32[2,1,256], index: 1, kind: input, shape index: {}]   ;;  %s954_s2 = inlined_call_operand.hbm [shape: f32[2,2,256], index: 2, kind: output, shape index: {}]  }
   0x1   :  { %9 = vsyncpa [#allocation3 + $0x1], 0 }
   0x2   :  { %10 = vsyncpa [#allocation6], 0 }
   0x3   :  { %12 = vsyncpa [#allocation6 + $0x1], 0 }
   0x4   :  { %13 = vsyncpa [#allocation4], 0 }
   0x5   :  { %15 = vsyncpa [#allocation4 + $0x1], 0  ;;  %s752_s9 = smov 0   ;;  %s754_s10 = smov 0  }
   0x6   :  { %s756_s11 = smov 0   ;;  %s758_s12 = smov 0  }
   0x7   :  { %s760_s13 = smov 0   ;;  %s762_s14 = smov 0  }
   0x8 LB: > { %s489_s15 = sadd.s32 4294967295, %s729_s14   ;;  %s490_s16 = sadd.s32 4294967294, %s729_s14   ;;  %s729_s14 = sphi %s762_s14, %s21_s14   ;;  %s725_s13 = sphi %s760_s13, %s966_s13   ;;  %s721_s12 = sphi %s758_s12, %s965_s12   ;;  %s717_s11 = sphi %s756_s11, %s964_s11   ;;  %s713_s10 = sphi %s754_s10, %s963_s10   ;;  %s709_s9 = sphi %s752_s9, %s962_s9  }
   0x9   : > { %s33_s17 = sadd.s32 1, %s725_s13  ;;  %s42_s18 = sadd.s32 1, %s717_s11 }
   0xa   : > { %p35_p0 = scmp.ge.s32.totalorder %s33_s17, 2  ;;  %p49_p1 = scmp.ne.s32.totalorder %s717_s11, %s713_s10 }
   0xb   : > { %p50_p2 = scmp.eq.s32.totalorder %s729_s14, 0  ;;  %p55_p3 = scmp.ne.s32.totalorder %s713_s10, %s709_s9 }
   0xc   : > { %s968_s17 = smov (%p35_p0, %s33_s17), 0  ;;  %p56_p5 = scmp.eq.s32.totalorder %s489_s15, 0 }
   0xd   : > { %p793_p4 = por %p50_p2, %p49_p1  ;;  %s37_s20 = ssub.s32 %s725_s13, %s968_s17 }
   0xe   : > { %p107_p6 = scmp.eq.s32.totalorder %s489_s15, 1  ;;  %p40_p7 = scmp.eq.s32.totalorder %s37_s20, 0 }
   0xf   : > { %p799_p8 = por %p56_p5, %p55_p3  ;;  %p113_p10 = scmp.eq.s32.totalorder %s490_s16, 1 }
  0x10   : > { %p803_p9 = por %p107_p6, %p49_p1  ;;  %p529_p13 = scmp.lt.s32.totalorder %s729_s14, 2 }
  0x11   : > { %s808_s23 = scalar_select %p40_p7, %s717_s11, %s42_s18  }
  0x12   : > { %p810_p11 = por %p113_p10, %p55_p3  ;;  %s817_s25 = sand.u32 1, %s717_s11  }
  0x13   : > { %s493_s26 = sshll.u32 %s817_s25, 3  ;;  %s509_s27 = sshll.u32 %s725_s13, 7 }
  0x14   : > { %s145_s30 = scalar_lea.hbm %s952_s0, %s509_s27  ;;  %s137_s3 = scalar_lea.vmem [#allocation2], %s493_s26 }
  0x15   : > { %s147_s4 = sshll.u32 %s137_s3, 4  ;;  %p826_p0 = pnand %p529_p13, %p793_p4  ;;  %s148_s4 = int_to_ptr.vmem [resolvable:$true] %s147_s4 }
  0x16   : > { %p499_p1 = scmp.ge.s32.totalorder %s729_s14, 1  ;;  %p173_p2 = scmp.lt.s32.totalorder %s729_s14, 3 }
  0x17   : > { %s134_s6 = scalar_lea.sflag [#allocation3], %s817_s25  ;;  %p591_p3 = pneg %p826_p0 }
  0x18   : > { %s602_s7 = scalar_lea.vmem %s148_s4, 128  ;;  %s731_s8 = smov [#allocation2]  }
  0x19   : > { %p603_p5 = scmp.ne.s32.totalorder %s148_s4, %s602_s7  ;;  %s607_s15 = sshll.u32 %s731_s8, 4  ;;  %s608_s15 = int_to_ptr.vmem [resolvable:$false] %s607_s15 }
  0x1a   : > { %s609_s16 = scalar_lea.vmem %s608_s15, 256  ;;  %p610_p4 = scmp.lt.s32.totalorder %s148_s4, %s608_s15 }
  0x1b   : > { %p605_p6 = pnand %p603_p5, %p591_p3  ;;  %p611_p10 = scmp.lt.s32.totalorder %s609_s16, %s602_s7 }
  0x1d   : > { %p606_p7 = pneg %p605_p6  ;;  %p612_p13 = por %p611_p10, %p610_p4 }
  0x1f   : > { %p613_p12 = pnand %p612_p13, %p606_p7 }
  0x21   : > { %616 = shalt.err (!%p613_p12)
}
  0x22   : > { %521 = dma.hbm_to_vmem [thread:$0]  (!%p826_p0), %s145_s30, 128, %s148_s4, %s134_s6  }
  0x23   : > { %p844_p5 = pnand %p499_p1, %p173_p2  ;;  %s496_s19 = sshll.u32 %s817_s25, 1 }
  0x24   : > { %s510_s20 = sshll.u32 %s725_s13, 5  ;;  %s158_s29 = scalar_lea.vmem [#allocation5], %s496_s19 }
  0x25   : > { %s166_s28 = scalar_lea.hbm %s953_s1, %s510_s20  ;;  %s168_s3 = sshll.u32 %s158_s29, 4  ;;  %s169_s3 = int_to_ptr.vmem [resolvable:$true] %s168_s3 }
  0x26   : > { %s155_s7 = scalar_lea.sflag [#allocation6], %s817_s25  ;;  %s630_s8 = scalar_lea.vmem %s169_s3, 32 }
  0x27   : > { %p631_p12 = scmp.ne.s32.totalorder %s169_s3, %s630_s8  ;;  %s732_s30 = smov [#allocation5]  }
  0x28   : > { %s635_s4 = sshll.u32 %s732_s30, 4  ;;  %s636_s4 = int_to_ptr.vmem [resolvable:$false] %s635_s4 }
  0x29   : > { %p633_p6 = pnand %p631_p12, %p591_p3  ;;  %s637_s6 = scalar_lea.vmem %s636_s4, 64 }
  0x2a   : > { %p638_p1 = scmp.lt.s32.totalorder %s169_s3, %s636_s4  ;;  %p639_p2 = scmp.lt.s32.totalorder %s637_s6, %s630_s8 }
  0x2b   : > { %p634_p7 = pneg %p633_p6 }
  0x2c   : > { %p640_p4 = por %p639_p2, %p638_p1 }
  0x2e   : > { %p641_p10 = pnand %p640_p4, %p634_p7 }
  0x30   : > { %644 = shalt.err (!%p641_p10)
}
  0x31   : > { %524 = dma.hbm_to_vmem [thread:$0]  (!%p826_p0), %s166_s28, 32, %s169_s3, %s155_s7  }
  0x32   : > { %177 = sbr.rel (%p844_p5) target bundleno = 157 (0x9d), region = 28  ;;  %s862_s25 = sand.u32 (!%p844_p5), 1, %s713_s10  }
  0x33   : > { %s500_s15 = sshll.u32 (!%p844_p5), %s862_s25, 3  ;;  %s180_s16 = scalar_lea.sflag (!%p844_p5), [#allocation3], %s862_s25 }
  0x34   : > { %s183_s19 = scalar_lea.vmem (!%p844_p5), [#allocation2], %s500_s15 }
  0x37   : > { %696 = dma.done.wait (%p799_p8), %s180_s16, 128  }
  0x38   : > { %698 = vsyncadd (%p799_p8), %s180_s16, 4294967168  ;;  %s501_s5 = sshll.u32 %s862_s25, 1  ;;  %s189_s18 = scalar_lea.sflag [#allocation6], %s862_s25 }
  0x39   : > { %s872_s20 = scalar_lea.vmem [#allocation5], %s501_s5 }
  0x3a   : > { %700 = dma.done.wait (%p799_p8), %s189_s18, 32  }
  0x3b   : > { %702 = vsyncadd (%p799_p8), %s189_s18, 4294967264  ;;  %s502_s26 = sshll.u32 %s862_s25, 2  ;;  %v733_v0 = vmov 0.0   ;;  %vm229_vm0 = vcmask 1043456   ;;  %v225_v1 = vld [vmem:[%s183_s19] sm:$0xff]  ;;  %v273_v18 = vlaneseq  ;;  %vm351_vm4 = vcmask 1040384  }
  0x3c   : > { %s879_s27 = scalar_lea.vmem [#allocation7], %s502_s26  ;;  %v227_v2 = vcombine.high %v225_v1, %v225_v1  ;;  %v230_v3 = vsel %vm229_vm0, %v225_v1, -inf  ;;  %v272_v23 = vld [vmem:[%s872_s20] sm:$0x3]  ;;  %v734_v58 = vmov 1966171168  }
  0x3d   : > { %224 = vst [vmem:[%s879_s27] sm:$0xf] %v733_v0  ;;  %v231_v4 = vrot.slane %v230_v3, 4  ;;  %v885_v21 = vshrl.u32 %v273_v18, 7  ;;  %v311_v59 = vunpack.c.l.s4 %v734_v58  ;;  %vm304_vm3 = vcmp.ne.s32.totalorder %v272_v23, 4294967196  ;;  %s511_s21 = sshll.u32 %s721_s12, 6  ;;  %s382_s28 = sshll.u32 %s879_s27, 4  ;;  %s383_s28 = int_to_ptr.vmem [resolvable:$true] %s382_s28 }
  0x3e   : > { %v237_v5 = vsel %vm229_vm0, %v227_v2, -inf  ;;  %s380_s7 = scalar_lea.hbm %s954_s2, %s511_s21  ;;  %s368_s8 = scalar_lea.sflag [#allocation4], %s862_s25 }
  0x3f   : > { %v232_v6 = vmax.f32 %v230_v3, %v231_v4  ;;  %v238_v7 = vrot.slane %v237_v5, 4  ;;  %v888_v22 = vsub.s32 0, %v885_v21  ;;  %v892_v24 = vsub.s32 1, %v885_v21  ;;  %s645_s30 = scalar_lea.vmem %s383_s28, 64  ;;  %s736_s4 = smov [#allocation7]  }
  0x40   : > { %p646_p8 = scmp.ne.s32.totalorder %s383_s28, %s645_s30  ;;  %s649_s6 = sshll.u32 %s736_s4, 4  ;;  %s650_s6 = int_to_ptr.vmem [resolvable:$false] %s649_s6 }
  0x41   : > { %v233_v8 = vrot.slane %v232_v6, 2  ;;  %v239_v9 = vmax.f32 %v237_v5, %v238_v7  ;;  %v278_v25 = vrot.slane %v272_v23, %v888_v22  ;;  %v282_v26 = vrot.slane %v272_v23, %v892_v24  ;;  %s651_s15 = scalar_lea.vmem %s650_s6, 128  ;;  %p652_p13 = scmp.lt.s32.totalorder %s383_s28, %s650_s6 }
  0x42   : > { %p647_p0 = pnand %p646_p8, %p803_p9  ;;  %p653_p5 = scmp.lt.s32.totalorder %s651_s15, %s645_s30 }
  0x43   : > { %v234_v10 = vmax.f32 %v232_v6, %v233_v8  ;;  %v240_v11 = vrot.slane %v239_v9, 2  ;;  %vm283_vm1 = vcmp.eq.s32.totalorder %v885_v21, %v278_v25  ;;  %vm284_vm2 = vcmp.eq.s32.totalorder %v885_v21, %v282_v26 }
  0x44   : > { %v735_v8 = vmov 1983009808   ;;  %v328_v25 = vld [vmem:[%s879_s27] sm:$0xf]  ;;  %p648_p3 = pneg %p647_p0  ;;  %p654_p12 = por %p653_p5, %p652_p13 }
  0x45   : > { %v235_v12 = vrot.slane %v234_v10, 1  ;;  %v241_v13 = vmax.f32 %v239_v9, %v240_v11  ;;  %v358_v9 = vunpack.c.l.s4 %v735_v8  ;;  %v503_v11 = vsel %vm304_vm3, 1.0, %v733_v0 }
  0x46   : > { %p655_p6 = pnand %p654_p12, %p648_p3 }
  0x47   : > { %v236_v14 = vmax.f32 %v234_v10, %v235_v12  ;;  %v242_v15 = vrot.slane %v241_v13, 1 }
  0x49   : > { %v243_v16 = vmax.f32 %v241_v13, %v242_v15  ;;  %v359_v13 = vunpack.c.0.s8 %v358_v9  ;;  %v348_v15 = vrot.slane %v503_v11, %v892_v24 }
  0x4b   : > { %v246_v17 = vcombine.low %v236_v14, %v243_v16  ;;  %v344_v14 = vrot.slane %v503_v11, %v888_v22 }
  0x4d   : > { %v248_v19 = vsub.f32 %v225_v1, %v246_v17  ;;  %v312_v1 = vunpack.c.0.s8 %v311_v59 }
  0x4f   : > { %v249_v20 = vmul.f32 1.442695, %v248_v19  ;;  %v286_v27 = vcombine.high %v248_v19, %v248_v19  ;;  %v288_v29 = vsel %vm283_vm1, %v248_v19, 0.0  ;;  %v315_v6 = vsub.s32 %v312_v1, %v885_v21 }
  0x50   : > { %v290_v35 = vsel %vm229_vm0, %v288_v29, 0.0  ;;  %v362_v19 = vsub.s32 %v359_v13, %v885_v21 }
  0x51   : > { %583 = vpow2.f32 %v249_v20  ;;  %v289_v33 = vsel %vm284_vm2, %v286_v27, 0.0  ;;  %v291_v41 = vrot.slane %v290_v35, 4 }
  0x52   : > { %v297_v38 = vsel %vm229_vm0, %v289_v33, 0.0 }
  0x53   : > { %v298_v44 = vrot.slane %v297_v38, 4  ;;  %v292_v47 = vadd.f32 %v291_v41, %v290_v35 }
  0x55   : > { %v299_v50 = vadd.f32 %v298_v44, %v297_v38  ;;  %v293_v52 = vrot.slane %v292_v47, 2 }
  0x57   : > { %v300_v53 = vrot.slane %v299_v50, 2  ;;  %v294_v54 = vadd.f32 %v293_v52, %v292_v47 }
  0x59   : > { %v301_v55 = vadd.f32 %v300_v53, %v299_v50  ;;  %v295_v56 = vrot.slane %v294_v54, 1 }
  0x5b   : > { %v302_v57 = vrot.slane %v301_v55, 1  ;;  %v296_v60 = vadd.f32 %v295_v56, %v294_v54 }
  0x5d   : > { %v303_v63 = vadd.f32 %v302_v57, %v301_v55 }
  0x5e   : > { %v584_v28 = vpop.eup %583 }
  0x5f   : > { %v252_v30 = vcombine.high %v584_v28, %v584_v28  ;;  %v254_v31 = vsel %vm229_vm0, %v584_v28, 0.0 }
  0x60   : > { %v255_v32 = vrot.slane %v254_v31, 4 }
  0x61   : > { %v261_v34 = vsel %vm229_vm0, %v252_v30, 0.0 }
  0x62   : > { %v256_v36 = vadd.f32 %v255_v32, %v254_v31  ;;  %v262_v37 = vrot.slane %v261_v34, 4 }
  0x64   : > { %v257_v39 = vrot.slane %v256_v36, 2  ;;  %v263_v40 = vadd.f32 %v262_v37, %v261_v34 }
  0x66   : > { %v258_v42 = vadd.f32 %v257_v39, %v256_v36  ;;  %v264_v43 = vrot.slane %v263_v40, 2 }
  0x68   : > { %v259_v45 = vrot.slane %v258_v42, 1  ;;  %v265_v46 = vadd.f32 %v264_v43, %v263_v40 }
  0x6a   : > { %v260_v48 = vadd.f32 %v259_v45, %v258_v42  ;;  %v266_v49 = vrot.slane %v265_v46, 1 }
  0x6c   : > { %v267_v51 = vadd.f32 %v266_v49, %v265_v46  ;;  %585 = vlog2.f32 %v260_v48 }
  0x6e   : > { %587 = vlog2.f32 %v267_v51 }
  0x79   : > { %v586_v61 = vpop.eup %585 }
  0x7a   : > { %v269_v62 = vmul.f32 0.6931472, %v586_v61 }
  0x7b   : > { %v588_v2 = vpop.eup %587 }
  0x7c   : > { %v271_v3 = vmul.f32 0.6931472, %v588_v2  ;;  %v305_v4 = vsub.f32 %v269_v62, %v296_v60 }
  0x7e   : > { %v306_v5 = vsub.f32 %v271_v3, %v303_v63 }
  0x80   : > { %v309_v7 = vcombine.low %v305_v4, %v306_v5 }
  0x82   : > { %v316_v10 = vrot.slane %v309_v7, %v315_v6 }
  0x84   : > { %v323_v12 = vrot.slane %v316_v10, %v315_v6 }
  0x86   : > { %v325_v16 = vsel %vm304_vm3, %v323_v12, 0.0 }
  0x87   : > { %v333_v17 = vrot.slane %v325_v16, %v888_v22  ;;  %v337_v18 = vrot.slane %v325_v16, %v892_v24 }
  0x89   : > { %v352_v20 = vsel %vm351_vm4, %v333_v17, %v344_v14  ;;  %v353_v23 = vsel %vm351_vm4, %v337_v18, %v348_v15 }
  0x8a   : > { %v356_v0 = vcombine.low %v352_v20, %v353_v23 }
  0x8c   : > { %v363_v26 = vrot.slane %v356_v0, %v362_v19 }
  0x8e   : > { %v365_v27 = vadd.f32 %v363_v26, %v328_v25 }
  0x90   : > { %366 = vst [vmem:[%s879_s27] sm:$0xf] %v365_v27 }
  0x91   : > { %658 = shalt.err (!%p655_p6)
}
  0x92   : > { %s659_s12 = scalar_lea.hbm %s380_s7, 64  ;;  %s663_s19 = scalar_lea.hbm %s954_s2, 128 }
  0x93   : > { %p660_p7 = scmp.ne.s32.totalorder %s380_s7, %s659_s12  ;;  %p664_p4 = scmp.lt.s32.totalorder %s380_s7, %s954_s2 }
  0x94   : > { %p665_p10 = scmp.lt.s32.totalorder %s663_s19, %s659_s12 }
  0x95   : > { %p661_p1 = pnand %p660_p7, %p803_p9 }
  0x96   : > { %p666_p8 = por %p665_p10, %p664_p4 }
  0x97   : > { %p662_p2 = pneg %p661_p1 }
  0x99   : > { %p667_p0 = pnand %p666_p8, %p662_p2 }
  0x9b   : > { %670 = shalt.err (!%p667_p0)
}
  0x9c   : > { %516 = dma.vmem_to_hbm [thread:$0]  (%p803_p9), %s383_s28, 64, %s380_s7, %s368_s8  }
  0x9d PF: > { %s394_s20 = sand.u32 1, %s709_s9   ;;  %p961_p3 = scmp.ge.s32.totalorder %s729_s14, 2 }
  0x9e   : > { %s395_s26 = scalar_lea.sflag [#allocation4], %s394_s20 }
  0x9f   : > { %p526_p13 = pnand %p961_p3, %p810_p11 }
  0xa1   : > { %p527_p5 = pneg %p526_p13 }
  0xa3   : > { %704 = dma.done.wait (%p527_p5), %s395_s26, 64  }
  0xa4   : > { %706 = vsyncadd (%p527_p5), %s395_s26, 4294967232  ;;  %s21_s14 = sadd.s32 1, %s729_s14   ;;  %s962_s9 = smov %s713_s10 }
  0xa5   : > { %p18_p12 = scmp.ge.s32.totalorder %s21_s14, 4   ;;  %s963_s10 = smov %s717_s11 }
  0xa6   : > { %s964_s11 = smov %s808_s23  ;;  %s965_s12 = smov %s725_s13 }
  0xa7   : > { %s966_s13 = smov %s968_s17  ;;  %20 = sbr.rel (!%p18_p12) target bundleno = 8 (0x8), region = 90 }
  0xac   :  { %400 = vsyncpa [#allocation3], 1 }
  0xad   :  { %402 = vsyncpa [#allocation3 + $0x1], 1 }
  0xae   :  { %403 = vsyncpa [#allocation6], 1 }
  0xaf   :  { %405 = vsyncpa [#allocation6 + $0x1], 1 }
  0xb0   :  { %406 = vsyncpa [#allocation4], 1 }
  0xb1   :  { %408 = vsyncpa [#allocation4 + $0x1], 1 }

</bundles_post_ra>
